<compile_context>
chip_gen: v6e
topology: v6e:2x2x1
jax: 0.10.0
libtpu: 0.0.40
codegen_flags: <defaults>
</compile_context>

<pallas_src>
import jax
import jax.numpy as jnp
from jax.experimental import pallas as pl
from jax.experimental.pallas import tpu as pltpu

LANE = 128          # vreg lane width
OUT_SUBLANE = 16    # bf16 sublane packing -> batch tile must be a multiple of 16


def _round_up(x, m):
    return (x + m - 1) // m * m


def mlp_kernel(x_ref, w1_ref, b1_ref, w2_ref, b2_ref, o_ref):
    # x_ref:  (TILE_N, 784)     f32   w1_ref: (784, H_p)     bf16
    # b1_ref: (1, H_p)          f32   w2_ref: (H_p, D_out_p) bf16
    # b2_ref: (1, D_out_p)      f32   o_ref:  (TILE_N, D_out_p) bf16
    x = x_ref[...].astype(jnp.bfloat16)                          # in-kernel cast (VPU)
    h = jnp.dot(x, w1_ref[...], preferred_element_type=jnp.float32)
    h = jnp.maximum(h + b1_ref[...], 0.0)                        # ReLU (f32)
    y = jnp.dot(h.astype(jnp.bfloat16), w2_ref[...],
                preferred_element_type=jnp.float32)
    o_ref[...] = jnp.maximum(y + b2_ref[...], 0.0).astype(o_ref.dtype)  # ReLU -> bf16


def fashion_mnist_model_v1(x_nchw, w1, b1, w2, b2, *, tile_n=1024):
    """Forward pass matching the PyTorch module.

    x_nchw: (N, C, H, W) float32
    w1: (D_in, hidden), b1: (hidden,)   -- transpose of torch Linear.weight layout
    w2: (hidden, D_out), b2: (D_out,)
    returns: (N, D_out) float32
    """
    n = x_nchw.shape[0]
    d_in = w1.shape[0]
    hidden = w1.shape[1]
    d_out = w2.shape[1]

    # Lane-dense padded sizes for the small dims only (D_in stays at 784).
    h_p = _round_up(hidden, LANE)      # 32  -> 128
    d_out_p = _round_up(d_out, LANE)   # 10  -> 128

    # Batch tiling: tile_n rows per grid step, rounded to a multiple of 16 so the
    # bf16 output block always meets the (16, 128) tiling constraint; batch padded
    # to a whole number of tiles.  Weights stay VMEM-resident (constant block idx).
    tile_n = _round_up(max(1, min(tile_n, _round_up(n, OUT_SUBLANE))), OUT_SUBLANE)
    n_pad = _round_up(n, tile_n)
    grid = (n_pad // tile_n,)

    # nn.Flatten is a free row-major reshape; no dtype cast, no D_in padding.
    x2d = x_nchw.reshape(n, d_in)
    if n_pad != n:
        x2d = jnp.pad(x2d, ((0, n_pad - n), (0, 0)))

    w1_p = jnp.pad(w1, ((0, 0), (0, h_p - hidden))).astype(jnp.bfloat16)           # (784, 128)
    b1_p = jnp.pad(b1, (0, h_p - hidden)).reshape(1, h_p).astype(jnp.float32)
    w2_p = jnp.pad(w2, ((0, h_p - hidden), (0, d_out_p - d_out))).astype(jnp.bfloat16)
    b2_p = jnp.pad(b2, (0, d_out_p - d_out)).reshape(1, d_out_p).astype(jnp.float32)

    cost = pl.CostEstimate(
        flops=2 * n_pad * (d_in * hidden + hidden * d_out),
        transcendentals=0,
        bytes_accessed=(x2d.size * 4 + w1_p.size * 2 + w2_p.size * 2
                        + b1_p.size * 4 + b2_p.size * 4 + n_pad * d_out_p * 2),
    )

    out = pl.pallas_call(
        mlp_kernel,
        out_shape=jax.ShapeDtypeStruct((n_pad, d_out_p), jnp.bfloat16),
        grid_spec=pltpu.PrefetchScalarGridSpec(
            num_scalar_prefetch=0,
            grid=grid,
            in_specs=[
                # x: tiled over batch; last dim = full array dim (784), single f32 read.
                pl.BlockSpec((tile_n, d_in), lambda i: (i, 0)),
                # Resident weights/biases (constant block index -> fetched once).
                # TODO(synk): pipeline_mode=pl.Buffered(1) would trim ~260 KB of
                # double-buffer VMEM; unnecessary at this tile size.
                pl.BlockSpec((d_in, h_p), lambda i: (0, 0)),
                pl.BlockSpec((1, h_p), lambda i: (0, 0)),
                pl.BlockSpec((h_p, d_out_p), lambda i: (0, 0)),
                pl.BlockSpec((1, d_out_p), lambda i: (0, 0)),
            ],
            out_specs=pl.BlockSpec((tile_n, d_out_p), lambda i: (i, 0)),
        ),
        compiler_params=pltpu.CompilerParams(
            # TODO(synk): on v7x, switch to pltpu.CORE_PARALLEL for the batch axis
            # if profiling shows only one TensorCore active.
            dimension_semantics=("parallel",),
        ),
        cost_estimate=cost,
    )(x2d, w1_p, b1_p, w2_p, b2_p)

    # Strip batch + lane padding and restore f32 logits outside the kernel.
    return out[:n, :d_out].astype(jnp.float32)


if __name__ == "__main__":
    # FashionMNIST-like config: batch=8, 1x28x28 images -> 784 features,
    # hidden_units=32, output_shape=10.
    N, C, H, W = 8, 1, 28, 28
    D_IN = C * H * W
    HIDDEN = 32
    D_OUT = 10

    key = jax.random.PRNGKey(0)
    kx, kw1, kb1, kw2, kb2 = jax.random.split(key, 5)

    x = jax.random.normal(kx, (N, C, H, W), dtype=jnp.float32)

    # Deterministic parameter init, stored as (in, out) = transpose of torch layout.
    bound1 = 1.0 / (D_IN ** 0.5)
    w1 = jax.random.uniform(kw1, (D_IN, HIDDEN), jnp.float32, -bound1, bound1)
    b1 = jax.random.uniform(kb1, (HIDDEN,), jnp.float32, -bound1, bound1)
    bound2 = 1.0 / (HIDDEN ** 0.5)
    w2 = jax.random.uniform(kw2, (HIDDEN, D_OUT), jnp.float32, -bound2, bound2)
    b2 = jax.random.uniform(kb2, (D_OUT,), jnp.float32, -bound2, bound2)

    out = fashion_mnist_model_v1(x, w1, b1, w2, b2)
    out = jax.block_until_ready(out)
    assert out.shape == (N, D_OUT)

    # Reference with matching numerics: bf16 MXU operands, f32 accumulation,
    # bf16 output storage (intentional deviation from pure-f32 torch numerics).
    x2d = x.reshape(N, D_IN)
    h_ref = jnp.maximum(
        jnp.dot(x2d.astype(jnp.bfloat16), w1.astype(jnp.bfloat16),
                preferred_element_type=jnp.float32) + b1, 0.0)
    y_ref = jnp.maximum(
        jnp.dot(h_ref.astype(jnp.bfloat16), w2.astype(jnp.bfloat16),
                preferred_element_type=jnp.float32) + b2, 0.0)
    ref_bf16 = y_ref.astype(jnp.bfloat16).astype(jnp.float32)
    assert jnp.allclose(out, ref_bf16, atol=2e-3, rtol=2e-3)

    # Loose sanity check against the pure-f32 forward pass.
    ref_f32 = jnp.maximum(jnp.maximum(x2d @ w1 + b1, 0.0) @ w2 + b2, 0.0)
    assert jnp.allclose(out, ref_f32, atol=5e-2, rtol=5e-2)

    print("KERNEL_OK")
</pallas_src>

<mosaic_0001>
module attributes {stable_mosaic.version = 11 : i64} {
  func.func @mlp_kernel(%arg0: i32, %arg1: memref<16x784xf32, #tpu.memory_space<vmem>>, %arg2: memref<784x128xbf16, #tpu.memory_space<vmem>>, %arg3: memref<1x128xf32, #tpu.memory_space<vmem>>, %arg4: memref<128x128xbf16, #tpu.memory_space<vmem>>, %arg5: memref<1x128xf32, #tpu.memory_space<vmem>>, %arg6: memref<16x128xbf16, #tpu.memory_space<vmem>>) attributes {dimension_semantics = [#tpu.dimension_semantics<parallel>], iteration_bounds = array<i64: 1>, scalar_prefetch = 0 : i64, scratch_operands = 0 : i64, tpu.core_type = #tpu.core_type<tc>, window_params = [{transform_indices = @transform_0, window_bounds = array<i64: 16, 784>}, {pipeline_mode = #tpu.pipeline_mode<synchronous>, transform_indices = @transform_1, window_bounds = array<i64: 784, 128>}, {pipeline_mode = #tpu.pipeline_mode<synchronous>, transform_indices = @transform_2, window_bounds = array<i64: 1, 128>}, {pipeline_mode = #tpu.pipeline_mode<synchronous>, transform_indices = @transform_3, window_bounds = array<i64: 128, 128>}, {pipeline_mode = #tpu.pipeline_mode<synchronous>, transform_indices = @transform_4, window_bounds = array<i64: 1, 128>}, {transform_indices = @transform_5, window_bounds = array<i64: 16, 128>}]} {
    %c0 = arith.constant 0 : index
    %c0_0 = arith.constant 0 : index
    %0 = vector.load %arg1[%c0, %c0_0] : memref<16x784xf32, #tpu.memory_space<vmem>>, vector<16x784xf32>
    %1 = arith.truncf %0 : vector<16x784xf32> to vector<16x784xbf16>
    %c0_1 = arith.constant 0 : index
    %c0_2 = arith.constant 0 : index
    %2 = vector.load %arg2[%c0_1, %c0_2] : memref<784x128xbf16, #tpu.memory_space<vmem>>, vector<784x128xbf16>
    %cst = arith.constant dense<0.000000e+00> : vector<16x128xf32>
    %3 = tpu.matmul %1, %2, %cst {dimension_numbers = #tpu.dot_dimension_numbers<[1], [0], [0], [1], [0, 0, 1, 1], [], []>} : vector<16x784xbf16>, vector<784x128xbf16>, vector<16x128xf32> -> vector<16x128xf32>
    %c0_3 = arith.constant 0 : index
    %c0_4 = arith.constant 0 : index
    %4 = vector.load %arg3[%c0_3, %c0_4] : memref<1x128xf32, #tpu.memory_space<vmem>>, vector<1x128xf32>
    %5 = vector.broadcast %4 : vector<1x128xf32> to vector<16x128xf32>
    %6 = arith.addf %3, %5 : vector<16x128xf32>
    %cst_5 = arith.constant 0.000000e+00 : f32
    %7 = vector.broadcast %cst_5 : f32 to vector<16x128xf32>
    %8 = arith.maximumf %6, %7 : vector<16x128xf32>
    %9 = arith.truncf %8 : vector<16x128xf32> to vector<16x128xbf16>
    %c0_6 = arith.constant 0 : index
    %c0_7 = arith.constant 0 : index
    %10 = vector.load %arg4[%c0_6, %c0_7] : memref<128x128xbf16, #tpu.memory_space<vmem>>, vector<128x128xbf16>
    %cst_8 = arith.constant dense<0.000000e+00> : vector<16x128xf32>
    %11 = tpu.matmul %9, %10, %cst_8 {dimension_numbers = #tpu.dot_dimension_numbers<[1], [0], [0], [1], [0, 0, 1, 1], [], []>} : vector<16x128xbf16>, vector<128x128xbf16>, vector<16x128xf32> -> vector<16x128xf32>
    %c0_9 = arith.constant 0 : index
    %c0_10 = arith.constant 0 : index
    %12 = vector.load %arg5[%c0_9, %c0_10] : memref<1x128xf32, #tpu.memory_space<vmem>>, vector<1x128xf32>
    %13 = vector.broadcast %12 : vector<1x128xf32> to vector<16x128xf32>
    %14 = arith.addf %11, %13 : vector<16x128xf32>
    %cst_11 = arith.constant 0.000000e+00 : f32
    %15 = vector.broadcast %cst_11 : f32 to vector<16x128xf32>
    %16 = arith.maximumf %14, %15 : vector<16x128xf32>
    %17 = arith.truncf %16 : vector<16x128xf32> to vector<16x128xbf16>
    %c0_12 = arith.constant 0 : index
    %c0_13 = arith.constant 0 : index
    %18 = vector.load %arg6[%c0_12, %c0_13] : memref<16x128xbf16, #tpu.memory_space<vmem>>, vector<16x128xbf16>
    tpu.vector_store %arg6[%c0_12, %c0_13], %17 {strides = array<i32>} : memref<16x128xbf16, #tpu.memory_space<vmem>>, vector<16x128xbf16>,
    return
  }
  func.func @transform_0(%arg0: i32) -> (i32, i32) {
    %c0_i32 = arith.constant 0 : i32
    %c0_i32_0 = arith.constant 0 : i32
    return %arg0, %c0_i32 : i32, i32
  }
  func.func @transform_1(%arg0: i32) -> (i32, i32) {
    %c0_i32 = arith.constant 0 : i32
    %c0_i32_0 = arith.constant 0 : i32
    %c0_i32_1 = arith.constant 0 : i32
    return %c0_i32, %c0_i32_0 : i32, i32
  }
  func.func @transform_2(%arg0: i32) -> (i32, i32) {
    %c0_i32 = arith.constant 0 : i32
    %c0_i32_0 = arith.constant 0 : i32
    %c0_i32_1 = arith.constant 0 : i32
    return %c0_i32, %c0_i32_0 : i32, i32
  }
  func.func @transform_3(%arg0: i32) -> (i32, i32) {
    %c0_i32 = arith.constant 0 : i32
    %c0_i32_0 = arith.constant 0 : i32
    %c0_i32_1 = arith.constant 0 : i32
    return %c0_i32, %c0_i32_0 : i32, i32
  }
  func.func @transform_4(%arg0: i32) -> (i32, i32) {
    %c0_i32 = arith.constant 0 : i32
    %c0_i32_0 = arith.constant 0 : i32
    %c0_i32_1 = arith.constant 0 : i32
    return %c0_i32, %c0_i32_0 : i32, i32
  }
  func.func @transform_5(%arg0: i32) -> (i32, i32) {
    %c0_i32 = arith.constant 0 : i32
    %c0_i32_0 = arith.constant 0 : i32
    return %arg0, %c0_i32 : i32, i32
  }
}

</mosaic_0001>

<bundles_post_ra>
// kernel: tpu_custom_call.1
= control target key start
LH: loop header
LB: loop body
LE: loop exit
PB: predicated region body
PF: predicated region fallthrough
CT: control target
= control target key end

     0   :  { %10 = vsyncpa [#allocation3], 0  ;;  %s1201_s0 = inlined_call_operand.hbm [shape: f32[16,784], index: 0, kind: input, shape index: {}]   ;;  %s1202_s1 = inlined_call_operand.hbm [shape: bf16[784,128], index: 1, kind: input, shape index: {}]   ;;  %s1203_s2 = inlined_call_operand.vmem [shape: f32[1,128], index: 2, kind: input, shape index: {}]   ;;  %s1204_s3 = inlined_call_operand.hbm [shape: bf16[128,128], index: 3, kind: input, shape index: {}]   ;;  %s1205_s4 = inlined_call_operand.vmem [shape: f32[1,128], index: 4, kind: input, shape index: {}]   ;;  %s1206_s5 = inlined_call_operand.hbm [shape: bf16[16,128], index: 5, kind: output, shape index: {}]  }
   0x1   :  { %11 = vsyncpa [#allocation6], 0 }
   0x2   :  { %12 = vsyncpa [#allocation4], 0  ;;  %s1121_s18 = smov [#allocation5]  }
   0x3   :  { %s30_s19 = sshll.u32 %s1121_s18, 4  ;;  %s31_s19 = int_to_ptr.vmem [resolvable:$true] %s30_s19 }
   0x4   :  { %s1043_s20 = scalar_lea.vmem %s31_s19, 6272  ;;  %p1048_p1 = scmp.lt.s32.totalorder %s31_s19, %s31_s19 }
   0x5   :  { %p1044_p0 = scmp.ne.s32.totalorder %s31_s19, %s1043_s20  ;;  %p1049_p2 = scmp.lt.s32.totalorder %s1043_s20, %s1043_s20 }
   0x7   :  { %p1050_p3 = por %p1049_p2, %p1048_p1 }
   0x9   :  { %p1051_p4 = pnand %p1050_p3, %p1044_p0 }
   0xb   :  { %1054 = shalt.err (!%p1051_p4)
}
   0xc   :  { %s1122_s21 = smov 64   ;;  %s1123_s22 = smov 4  }
   0xd   :  { %36 = dma.hbm_to_vmem [thread:$0]  %s1202_s1, 6272, %s31_s19, [#allocation6], %s1122_s21, %s1122_s21, %s1123_s22  }
   0xe   :  { %s1124_s25 = smov [#allocation2]  }
   0xf   :  { %s18_s26 = sshll.u32 %s1124_s25, 4  ;;  %s19_s26 = int_to_ptr.vmem [resolvable:$true] %s18_s26 }
  0x10   :  { %s1063_s27 = scalar_lea.vmem %s19_s26, 1792  ;;  %p1068_p6 = scmp.lt.s32.totalorder %s19_s26, %s19_s26 }
  0x11   :  { %p1064_p5 = scmp.ne.s32.totalorder %s19_s26, %s1063_s27  ;;  %p1069_p7 = scmp.lt.s32.totalorder %s1063_s27, %s1063_s27 }
  0x13   :  { %p1070_p8 = por %p1069_p7, %p1068_p6 }
  0x15   :  { %p1071_p9 = pnand %p1070_p8, %p1064_p5 }
  0x17   :  { %1074 = shalt.err (!%p1071_p9)
}
  0x18   :  { %s1125_s28 = smov 896   ;;  %s1126_s29 = smov 56  }
  0x19   :  { %24 = dma.hbm_to_vmem [thread:$0]  %s1201_s0, 1792, %s19_s26, [#allocation3], %s1125_s28, %s1125_s28, %s1126_s29  }
  0x1a   :  { %s1127_s7 = smov [#allocation7]  }
  0x1b   :  { %s44_s8 = sshll.u32 %s1127_s7, 4  ;;  %s45_s8 = int_to_ptr.vmem [resolvable:$true] %s44_s8 }
  0x1c   :  { %s1083_s1 = scalar_lea.vmem %s45_s8, 1024  ;;  %p1088_p11 = scmp.lt.s32.totalorder %s45_s8, %s45_s8 }
  0x1d   :  { %p1084_p10 = scmp.ne.s32.totalorder %s45_s8, %s1083_s1  ;;  %p1089_p12 = scmp.lt.s32.totalorder %s1083_s1, %s1083_s1 }
  0x1f   :  { %p1090_p13 = por %p1089_p12, %p1088_p11 }
  0x21   :  { %p1091_p0 = pnand %p1090_p13, %p1084_p10 }
  0x23   :  { %1094 = shalt.err (!%p1091_p0)
}
  0x24   :  { %50 = dma.hbm_to_vmem [thread:$0]  %s1204_s3, 1024, %s45_s8, [#allocation6], %s1122_s21, %s1122_s21, %s1123_s22  }
  0x25   :  { %1115 = dma.done.wait [#allocation3], 1792  }
  0x26   :  { %1116 = vsyncadd [#allocation3], 4294965504 }
  0x27   :  { %1117 = dma.done.wait [#allocation6], 7296  }
  0x28   :  { %1118 = vsyncadd [#allocation6], 4294960000  ;;  %v978_v0 = vld [vmem:[#allocation5 + $0x78] sm:$0xff]   ;;  %v982_v4 = vld [vmem:[#allocation5 + $0x70] sm:$0xff]   ;;  %v1128_v43 = vmov 0.0   ;;  %vm1129_vm0 = vmmov 0  }
  0x29   :  { %v979_v1 = vld [vmem:[#allocation5 + $0x38] sm:$0xff]   ;;  %865 = vmatprep.subr.bf16.mxu0 %v978_v0  ;;  %v983_v5 = vld [vmem:[#allocation5 + $0x30] sm:$0xff]   ;;  %v986_v8 = vld [vmem:[#allocation5 + $0x68] sm:$0xff]   ;;  %vm483_vm1 = vcmask 130048   ;;  %s1130_s12 = smov [#allocation8]  }
  0x2a   :  { %v980_v2 = vld [vmem:[#allocation5 + $0xf8] sm:$0xff]   ;;  %866 = vmatpush3.bf16.msra.mxu0 %v979_v1  ;;  %v984_v6 = vld [vmem:[#allocation5 + $0xf0] sm:$0xff]   ;;  %v987_v9 = vld [vmem:[#allocation5 + $0x28] sm:$0xff]   ;;  %s783_s13 = sshll.u32 %s1130_s12, 4  ;;  %s784_s13 = int_to_ptr.vmem [resolvable:$true] %s783_s13 }
  0x2b   :  { %v981_v3 = vld [vmem:[#allocation5 + $0xb8] sm:$0xff]   ;;  %887 = vmatprep.subr.bf16.mxu1 %v980_v2  ;;  %867 = vmatprep.subr.bf16.mxu0 %v982_v4  ;;  %v985_v7 = vld [vmem:[#allocation5 + $0xb0] sm:$0xff]   ;;  %v988_v10 = vld [vmem:[#allocation5 + $0xe8] sm:$0xff]   ;;  %s1095_s14 = scalar_lea.vmem %s784_s13, 128  ;;  %p1100_p2 = scmp.lt.s32.totalorder %s784_s13, %s784_s13 }
  0x2c   :  { %888 = vmatpush3.bf16.msra.mxu1 %v981_v3  ;;  %v989_v11 = vld [vmem:[#allocation5 + $0xa8] sm:$0xff]   ;;  %v990_v12 = vld [vmem:[#allocation5 + $0x60] sm:$0xff]   ;;  %v994_v16 = vld [vmem:[#allocation5 + $0x58] sm:$0xff]   ;;  %p1096_p1 = scmp.ne.s32.totalorder %s784_s13, %s1095_s14  ;;  %p1101_p3 = scmp.lt.s32.totalorder %s1095_s14, %s1095_s14 }
  0x2d   :  { %889 = vmatprep.subr.bf16.mxu1 %v984_v6  ;;  %v991_v13 = vld [vmem:[#allocation5 + $0x20] sm:$0xff]   ;;  %v995_v17 = vld [vmem:[#allocation5 + $0x18] sm:$0xff]   ;;  %v998_v20 = vld [vmem:[#allocation5 + $0x50] sm:$0xff]  }
  0x2e   :  { %868 = vmatpush3.bf16.msra.mxu0 %v983_v5  ;;  %v992_v14 = vld [vmem:[#allocation5 + $0xe0] sm:$0xff]   ;;  %v996_v18 = vld [vmem:[#allocation5 + $0xd8] sm:$0xff]   ;;  %v999_v21 = vld [vmem:[#allocation5 + $0x10] sm:$0xff]   ;;  %p1102_p4 = por %p1101_p3, %p1100_p2 }
  0x2f   :  { %869 = vmatprep.subr.bf16.mxu0 %v986_v8  ;;  %v993_v15 = vld [vmem:[#allocation5 + $0xa0] sm:$0xff]   ;;  %v997_v19 = vld [vmem:[#allocation5 + $0x98] sm:$0xff]   ;;  %v1000_v22 = vld [vmem:[#allocation5 + $0xd0] sm:$0xff]  }
  0x30   :  { %890 = vmatpush3.bf16.msra.mxu1 %v985_v7  ;;  %v1001_v23 = vld [vmem:[#allocation5 + $0x90] sm:$0xff]   ;;  %v1002_v24 = vld [vmem:[#allocation5 + $0x48] sm:$0xff]   ;;  %v1006_v28 = vld [vmem:[#allocation5 + $0x40] sm:$0xff]   ;;  %p1103_p5 = pnand %p1102_p4, %p1096_p1 }
  0x31   :  { %891 = vmatprep.subr.bf16.mxu1 %v988_v10  ;;  %v1003_v25 = vld [vmem:[#allocation5 + $0x8] sm:$0xff]   ;;  %v1007_v29 = vld [vmem:[#allocation5] sm:$0xff]   ;;  %v64_v31 = vld [vmem:[#allocation2 + $0x8] sm:$0xff] }
  0x32   :  { %870 = vmatpush3.bf16.msra.mxu0 %v987_v9  ;;  %v1004_v26 = vld [vmem:[#allocation5 + $0xc8] sm:$0xff]   ;;  %v1008_v30 = vld [vmem:[#allocation5 + $0xc0] sm:$0xff]   ;;  %v71_v32 = vld [vmem:[#allocation2 + $0x40] sm:$0xff] }
  0x33   :  { %871 = vmatprep.subr.bf16.mxu0 %v990_v12  ;;  %v1005_v27 = vld [vmem:[#allocation5 + $0x88] sm:$0xff]   ;;  %v78_v33 = vpack.c.bf16 %v71_v32, %v64_v31  ;;  %v1009_v34 = vld [vmem:[#allocation5 + $0x80] sm:$0xff]   ;;  %v63_v35 = vld [vmem:[#allocation2] sm:$0xff] }
  0x34   :  { %892 = vmatpush3.bf16.msra.mxu1 %v989_v11  ;;  %v70_v36 = vld [vmem:[#allocation2 + $0x38] sm:$0xff]  ;;  %v1010_v38 = vld [vmem:[#allocation5 + $0x178] sm:$0xff]   ;;  %v73_v40 = vld [vmem:[#allocation2 + $0x50] sm:$0xff] }
  0x35   :  { %893 = vmatprep.subr.bf16.mxu1 %v992_v14  ;;  %519 = vmatprep.mubr.bf16.mxu0 %v78_v33  ;;  %v77_v37 = vpack.c.bf16 %v70_v36, %v63_v35  ;;  %v66_v39 = vld [vmem:[#allocation2 + $0x18] sm:$0xff]  ;;  %v1011_v42 = vld [vmem:[#allocation5 + $0x138] sm:$0xff]   ;;  %v65_v44 = vld [vmem:[#allocation2 + $0x10] sm:$0xff] }
  0x36   :  { %872 = vmatpush3.bf16.msra.mxu0 %v991_v13  ;;  %v80_v41 = vpack.c.bf16 %v73_v40, %v66_v39  ;;  %v72_v45 = vld [vmem:[#allocation2 + $0x48] sm:$0xff]  ;;  %v1012_v47 = vld [vmem:[#allocation5 + $0x170] sm:$0xff]   ;;  %v1014_v49 = vld [vmem:[#allocation5 + $0x168] sm:$0xff]  }
  0x37   :  { %873 = vmatprep.subr.bf16.mxu0 %v994_v16  ;;  %v79_v46 = vpack.c.bf16 %v72_v45, %v65_v44  ;;  %v1013_v48 = vld [vmem:[#allocation5 + $0x130] sm:$0xff]   ;;  %v1015_v50 = vld [vmem:[#allocation5 + $0x128] sm:$0xff]   ;;  %v1016_v51 = vld [vmem:[#allocation5 + $0x160] sm:$0xff]  }
  0x38   :  { %894 = vmatpush3.bf16.msra.mxu1 %v993_v15  ;;  %560 = vmatprep.mubr.bf16.mxu1 %v80_v41  ;;  %v1017_v52 = vld [vmem:[#allocation5 + $0x120] sm:$0xff]   ;;  %v1018_v53 = vld [vmem:[#allocation5 + $0x158] sm:$0xff]   ;;  %v1020_v55 = vld [vmem:[#allocation5 + $0x150] sm:$0xff]  }
  0x39   :  { %895 = vmatprep.subr.bf16.mxu1 %v996_v18  ;;  %v1019_v54 = vld [vmem:[#allocation5 + $0x118] sm:$0xff]   ;;  %v1026_v56 = vld [vmem:[#allocation5 + $0x180] sm:$0xff]   ;;  %v1021_v58 = vld [vmem:[#allocation5 + $0x110] sm:$0xff]  }
  0x3a   :  { %874 = vmatpush3.bf16.msra.mxu0 %v995_v17  ;;  %v68_v57 = vld [vmem:[#allocation2 + $0x28] sm:$0xff]  ;;  %v1022_v59 = vld [vmem:[#allocation5 + $0x148] sm:$0xff]   ;;  %v75_v60 = vld [vmem:[#allocation2 + $0x60] sm:$0xff] }
  0x3b   :  { %875 = vmatprep.subr.bf16.mxu0 %v998_v20  ;;  %v82_v61 = vpack.c.bf16 %v75_v60, %v68_v57  ;;  %v69_v62 = vld [vmem:[#allocation2 + $0x30] sm:$0xff]  ;;  %v76_v63 = vld [vmem:[#allocation2 + $0x68] sm:$0xff]  ;;  %v1023_v1 = vld [vmem:[#allocation5 + $0x108] sm:$0xff]  }
  0x3c   :  { %896 = vmatpush3.bf16.msra.mxu1 %v997_v19  ;;  %v83_v0 = vpack.c.bf16 %v76_v63, %v69_v62  ;;  %v1024_v2 = vld [vmem:[#allocation5 + $0x140] sm:$0xff]   ;;  %v67_v4 = vld [vmem:[#allocation2 + $0x20] sm:$0xff]  ;;  %v74_v5 = vld [vmem:[#allocation2 + $0x58] sm:$0xff] }
  0x3d   :  { %897 = vmatprep.subr.bf16.mxu1 %v1000_v22  ;;  %v1025_v3 = vld [vmem:[#allocation5 + $0x100] sm:$0xff]   ;;  %v81_v6 = vpack.c.bf16 %v74_v5, %v67_v4  ;;  %v1028_v8 = vld [vmem:[#allocation7 + $0x30] sm:$0xff]   ;;  %v1029_v9 = vld [vmem:[#allocation7 + $0x28] sm:$0xff]  }
  0x3e   :  { %876 = vmatpush3.bf16.msra.mxu0 %v999_v21  ;;  %v1027_v7 = vld [vmem:[#allocation7 + $0x38] sm:$0xff]   ;;  %v1030_v10 = vld [vmem:[#allocation7 + $0x20] sm:$0xff]   ;;  %v1032_v12 = vld [vmem:[#allocation7 + $0x10] sm:$0xff]  }
  0x3f   :  { %877 = vmatprep.subr.bf16.mxu0 %v1002_v24  ;;  %v1031_v11 = vld [vmem:[#allocation7 + $0x18] sm:$0xff]   ;;  %v1033_v13 = vld [vmem:[#allocation7 + $0x8] sm:$0xff]   ;;  %v1034_v14 = vld [vmem:[#allocation7] sm:$0xff]  }
  0x40   :  { %898 = vmatpush3.bf16.msra.mxu1 %v1001_v23 }
  0x41   :  { %899 = vmatprep.subr.bf16.mxu1 %v1004_v26 }
  0x42   :  { %878 = vmatpush3.bf16.msra.mxu0 %v1003_v25 }
  0x43   :  { %879 = vmatprep.subr.bf16.mxu0 %v1006_v28 }
  0x44   :  { %900 = vmatpush3.bf16.msra.mxu1 %v1005_v27  ;;  %v796_v27 = vld [vmem:[%s1203_s2] ss:$0 sm:$0xff] }
  0x45   :  { %901 = vmatprep.subr.bf16.mxu1 %v1008_v30 }
  0x46   :  { %880 = vmatpush3.bf16.msra.mxu0 %v1007_v29 }
  0x47   :  { %909 = vmatprep.subr.bf16.mxu0 %v1010_v38 }
  0x48   :  { %902 = vmatpush3.bf16.msra.mxu1 %v1009_v34 }
  0x49   :  { %942 = vmatprep.subr.bf16.mxu1 %v1128_v43  ;;  %520 = vmatmul.mubr.bf16.vlgmr.msra.gmra.mxu0 %v77_v37 }
  0x4a   :  { %910 = vmatpush3.bf16.msra.mxu0 %v1011_v42  ;;  %601 = vmatprep.mubr.bf16.mxu0 %v82_v61 }
  0x4b   :  { %561 = vmatmul.mubr.bf16.vlgmr.msra.gmra.mxu1 %v79_v46  ;;  %911 = vmatprep.subr.bf16.mxu0 %v1012_v47 }
  0x4c   :  { %944 = vmatprep.mubr.msk.bf16.mxu1 %vm1129_vm0, %v1128_v43  ;;  %943 = vmatpush3.bf16.msra.mxu1 %v1026_v56 }
  0x4d   :  { %948 = vmatprep.subr.bf16.mxu1 %v1128_v43 }
  0x4e   :  { %912 = vmatpush3.bf16.msra.mxu0 %v1013_v48 }
  0x4f   :  { %913 = vmatprep.subr.bf16.mxu0 %v1014_v49  ;;  %v847_v49 = vld [vmem:[%s1205_s4] ss:$0 sm:$0xff] }
  0x52   :  { %914 = vmatpush3.bf16.msra.mxu0 %v1015_v50 }
  0x53   :  { %915 = vmatprep.subr.bf16.mxu0 %v1016_v51  ;;  %945 = vmatmul.mubr.msk.bf16.vlgmr.msra.gmra.mxu1 %vm483_vm1, %v83_v0 }
  0x54   :  { %964 = vmatprep.mubr.msk.bf16.mxu1 %vm1129_vm0, %v1128_v43  ;;  %949 = vmatpush3.bf16.msra.mxu1 %v1027_v7 }
  0x55   :  { %950 = vmatprep.subr.bf16.mxu1 %v1128_v43 }
  0x56   :  { %916 = vmatpush3.bf16.msra.mxu0 %v1017_v52 }
  0x57   :  { %917 = vmatprep.subr.bf16.mxu0 %v1018_v53 }
  0x58   :  { %951 = vmatpush3.bf16.msra.mxu1 %v1028_v8 }
  0x59   :  { %952 = vmatprep.subr.bf16.mxu1 %v1128_v43 }
  0x5a   :  { %918 = vmatpush3.bf16.msra.mxu0 %v1019_v54 }
  0x5b   :  { %919 = vmatprep.subr.bf16.mxu0 %v1020_v55 }
  0x5c   :  { %953 = vmatpush3.bf16.msra.mxu1 %v1029_v9 }
  0x5d   :  { %954 = vmatprep.subr.bf16.mxu1 %v1128_v43 }
  0x5e   :  { %920 = vmatpush3.bf16.msra.mxu0 %v1021_v58 }
  0x5f   :  { %921 = vmatprep.subr.bf16.mxu0 %v1022_v59 }
  0x60   :  { %955 = vmatpush3.bf16.msra.mxu1 %v1030_v10 }
  0x61   :  { %956 = vmatprep.subr.bf16.mxu1 %v1128_v43 }
  0x62   :  { %922 = vmatpush3.bf16.msra.mxu0 %v1023_v1 }
  0x63   :  { %923 = vmatprep.subr.bf16.mxu0 %v1024_v2 }
  0x64   :  { %957 = vmatpush3.bf16.msra.mxu1 %v1031_v11 }
  0x65   :  { %958 = vmatprep.subr.bf16.mxu1 %v1128_v43 }
  0x66   :  { %924 = vmatpush3.bf16.msra.mxu0 %v1025_v3 }
  0x68   :  { %959 = vmatpush3.bf16.msra.mxu1 %v1032_v12 }
  0x69   :  { %602 = vmatmul.mubr.bf16.vlgmr.msra.gmra.mxu0 %v81_v6  ;;  %960 = vmatprep.subr.bf16.mxu1 %v1128_v43 }
  0x6c   :  { %961 = vmatpush3.bf16.msra.mxu1 %v1033_v13 }
  0x6d   :  { %962 = vmatprep.subr.bf16.mxu1 %v1128_v43 }
  0x70   :  { %963 = vmatpush3.bf16.msra.mxu1 %v1034_v14 }
 0x109   :  { %v881_v18 = vpop.f32.mrf.mxu0 }
 0x10b   :  { %v903_v15 = vpop.f32.mrf.mxu1  ;;  %v882_v20 = vpop.f32.mrf.mxu0 }
 0x10c   :  { %v883_v26 = vadd.f32 %v882_v20, %v881_v18 }
 0x10d   :  { %v904_v16 = vpop.f32.mrf.mxu1  ;;  %v884_v23 = vpop.f32.mrf.mxu0 }
 0x10e   :  { %v522_v29 = vadd.f32 %v883_v26, %v796_v27  ;;  %v905_v30 = vadd.f32 %v904_v16, %v903_v15 }
 0x10f   :  { %v906_v17 = vpop.f32.mrf.mxu1  ;;  %v885_v28 = vpop.f32.mrf.mxu0 }
 0x110   :  { %v886_v31 = vadd.f32 %v885_v28, %v884_v23  ;;  %v563_v34 = vadd.f32 %v905_v30, %v522_v29 }
 0x111   :  { %v907_v19 = vpop.f32.mrf.mxu1 }
 0x112   :  { %v525_v35 = vadd.f32 %v886_v31, %v796_v27  ;;  %v908_v36 = vadd.f32 %v907_v19, %v906_v17 }
 0x113   :  { %v644_v21 = vpop.f32.mrf.mxu1 }
 0x114   :  { %v566_v41 = vadd.f32 %v908_v36, %v525_v35 }
 0x115   :  { %v946_v22 = vpop.f32.mrf.mxu1 }
 0x117   :  { %v647_v24 = vpop.f32.mrf.mxu1 }
 0x119   :  { %v947_v25 = vpop.f32.mrf.mxu1 }
 0x129   :  { %v925_v32 = vpop.f32.mrf.mxu0 }
 0x12b   :  { %v926_v33 = vpop.f32.mrf.mxu0 }
 0x12c   :  { %v927_v37 = vadd.f32 %v926_v33, %v925_v32 }
 0x12d   :  { %v928_v38 = vpop.f32.mrf.mxu0 }
 0x12e   :  { %v604_v39 = vadd.f32 %v927_v37, %v563_v34 }
 0x12f   :  { %v929_v40 = vpop.f32.mrf.mxu0 }
 0x130   :  { %v930_v42 = vadd.f32 %v929_v40, %v928_v38  ;;  %v645_v43 = vadd.f32 %v644_v21, %v604_v39 }
 0x132   :  { %v607_v44 = vadd.f32 %v930_v42, %v566_v41  ;;  %v651_v46 = vmax.f32 %v645_v43, 0.0 }
 0x134   :  { %v648_v45 = vadd.f32 %v647_v24, %v607_v44 }
 0x136   :  { %v652_v47 = vmax.f32 %v648_v45, 0.0 }
 0x138   :  { %v653_v48 = vpack.c.bf16 %v652_v47, %v651_v46 }
 0x13a   :  { %965 = vmatmul.mubr.bf16.vlgmr.msra.gmra.mxu1 %v653_v48 }
 0x1fa   :  { %v759_v50 = vpop.f32.mrf.mxu1 }
 0x1fb   :  { %v760_v52 = vadd.f32 %v847_v49, %v759_v50 }
 0x1fc   :  { %v966_v51 = vpop.f32.mrf.mxu1 }
 0x1fd   :  { %v766_v56 = vmax.f32 %v760_v52, 0.0 }
 0x1fe   :  { %v762_v53 = vpop.f32.mrf.mxu1 }
 0x1ff   :  { %v763_v54 = vadd.f32 %v847_v49, %v762_v53 }
 0x200   :  { %v967_v55 = vpop.f32.mrf.mxu1 }
 0x201   :  { %v767_v57 = vmax.f32 %v763_v54, 0.0 }
 0x203   :  { %v863_v58 = vpack.c.bf16 %v767_v57, %v766_v56 }
 0x205   :  { %864 = vst [vmem:[#allocation8] sm:$0xff] %v863_v58  }
 0x206   :  { %1106 = shalt.err (!%p1103_p5)
}
 0x207   :  { %789 = dma.vmem_to_hbm [thread:$0]  %s784_s13, 128, %s1206_s5, [#allocation4], %s1122_s21, %s1122_s21, %s1123_s22  }
 0x208   :  { %1119 = dma.done.wait [#allocation4], 128  }
 0x209   :  { %1120 = vsyncadd [#allocation4], 4294967168 }
 0x20a   :  { %793 = vsyncpa [#allocation3], 1 }
 0x20b   :  { %794 = vsyncpa [#allocation6], 1 }
 0x20c   :  { %795 = vsyncpa [#allocation4], 1 }

</bundles_post_ra>
